<compile_context>
chip_gen: v6e
topology: v6e:2x2x1
jax: 0.10.0
libtpu: 0.0.40
codegen_flags: <defaults>
</compile_context>

<pallas_src>
import functools

import jax
import jax.numpy as jnp
from jax.experimental import pallas as pl
from jax.experimental.pallas import tpu as pltpu

LN_EPS = 1e-5                       # nn.LayerNorm default eps
_HAS_BUFFERED = hasattr(pl, "Buffered")


def _round_up(x, m):
    return ((x + m - 1) // m) * m


def _const_spec(shape):
    """BlockSpec for a grid-invariant operand (index_map always the 0-block).

    Single-buffered when supported: double-buffering a block that is never
    re-fetched is pure VMEM waste (saves ~half the resident weight VMEM,
    essential for ViT-L-class models on v7x's 64 MiB/TC VMEM).
    """
    if _HAS_BUFFERED:
        return pl.BlockSpec(shape, lambda *_: (0,) * len(shape),
                            pipeline_mode=pl.Buffered(1))
    return pl.BlockSpec(shape, lambda *_: (0,) * len(shape))


def _vmem_limit_bytes():
    # Leave ~25% headroom below physical VMEM for compiler internal scratch,
    # semaphores and the output pipeline buffers:
    #   v5e/v6e (128 MiB physical) -> ~96 MiB; v7x (64 MiB physical) -> ~48 MiB.
    try:
        cap = pltpu.get_tpu_info().vmem_capacity_bytes
    except Exception:
        cap = 64 * 1024 * 1024
    return int(cap * 3 // 4)


def _layer_norm(x, gamma, beta):
    # PyTorch LayerNorm: biased variance over last dim (f32 math).
    mu = jnp.mean(x, axis=-1, keepdims=True)
    xc = x - mu
    var = jnp.mean(xc * xc, axis=-1, keepdims=True)
    return xc * jax.lax.rsqrt(var + LN_EPS) * gamma + beta


def _softmax_last(x):
    # EUP reciprocal keeps the (S,S) divide off the VALU.
    x = x - jnp.max(x, axis=-1, keepdims=True)
    e = jnp.exp(x)
    return e * pl.reciprocal(jnp.sum(e, axis=-1, keepdims=True), approx=True)


# --------------------------------------------------------------------------
# Patch embedding: Conv2d(k=P, stride=P) expressed as a matmul over unfolded
# patches, tiled over rows so large (B*N, C*P*P) inputs never OOM VMEM.
#   patches: (M, C*P*P) bf16, w: (C*P*P, D) bf16, b: (1, D) f32
# --------------------------------------------------------------------------
def _patch_embed_kernel(p_ref, w_ref, b_ref, o_ref):
    o_ref[...] = (
        jnp.dot(p_ref[...], w_ref[...], preferred_element_type=jnp.float32)
        + b_ref[...]
    )


def patch_embed(patches_2d, w, b):
    M, K = patches_2d.shape
    D = w.shape[1]
    TM = 1024 if M >= 1024 else M        # ~1024-row tiles ≈ 86% of HBM roofline
    Mp = _round_up(M, TM)
    if Mp != M:
        patches_2d = jnp.pad(patches_2d, ((0, Mp - M), (0, 0)))
    out = pl.pallas_call(
        _patch_embed_kernel,
        grid=(Mp // TM,),
        in_specs=[
            pl.BlockSpec((TM, K), lambda i: (i, 0)),
            _const_spec((K, D)),
            _const_spec((1, D)),
        ],
        out_specs=pl.BlockSpec((TM, D), lambda i: (i, 0)),
        out_shape=jax.ShapeDtypeStruct((Mp, D), jnp.float32),
        compiler_params=pltpu.CompilerParams(dimension_semantics=("parallel",)),
    )(patches_2d, w, b)
    return out[:M]


# --------------------------------------------------------------------------
# One fused ViT encoder block.  Processes Bt batch elements per grid step.
#   x_ref : (Bt, S_pad, D)  f32 residual stream
#   wqkv  : (D, 3D)  bf16  fused QKV projection ([q | k | v] columns, 1/sqrt(dh)
#                          already folded into the q columns)
#   wo    : (D, D)   bf16  output projection
#   w1/w2 : MLP weights (bf16)
#   ctx_ref : (Bt*S_pad, D) bf16 VMEM scratch for the per-head contexts.
# Both projections and the MLP are single fat matmuls over M = Bt*S_pad rows;
# the per-(batch, head) loop only covers the inherently per-head (S,S)
# attention and ends in a store to the scratch ref (bounding live ranges, no
# H-way concatenate).
# --------------------------------------------------------------------------
def _vit_block_kernel(x_ref, ln1g, ln1b, wqkv, wo, bo,
                      ln2g, ln2b, w1, b1, w2, b2, o_ref, ctx_ref,
                      *, num_heads, seq_len, bt):
    _, s_pad, D = x_ref.shape
    dh = D // num_heads
    M = bt * s_pad
    x = x_ref[...].reshape(M, D)                     # (M, D) f32

    # key-column mask for padded tokens: materialize the full (S_pad, S_pad)
    # bias ONCE (JAX does not CSE broadcast_in_dim).
    if seq_len < s_pad:
        col = jax.lax.broadcasted_iota(jnp.int32, (s_pad, s_pad), 1)
        mask_full = jnp.where(col < seq_len, 0.0, -1e30).astype(jnp.float32)
    else:
        mask_full = None

    # --- attention branch (pre-LN) ---
    h = _layer_norm(x, ln1g[...], ln1b[...])
    qkv = jnp.dot(h.astype(jnp.bfloat16), wqkv[...],
                  preferred_element_type=jnp.float32)          # (M, 3D) f32
    qkv = qkv.astype(jnp.bfloat16)                             # cast once

    for b in range(bt):
        r0 = b * s_pad                                          # sublane-aligned
        for hh in range(num_heads):
            lo = hh * dh
            qh = qkv[r0:r0 + s_pad, lo:lo + dh]                 # (S, dh) pre-scaled
            kh = qkv[r0:r0 + s_pad, D + lo:D + lo + dh]         # (S, dh)
            vh = qkv[r0:r0 + s_pad, 2 * D + lo:2 * D + lo + dh] # (S, dh)
            att = jax.lax.dot_general(
                qh, kh, (((1,), (1,)), ((), ())),
                preferred_element_type=jnp.float32)             # (S, S) lane-dense
            if mask_full is not None:
                att = att + mask_full
            att = _softmax_last(att)
            # write the head's context straight at its final column offset
            ctx_ref[r0:r0 + s_pad, lo:lo + dh] = jnp.dot(
                att.astype(jnp.bfloat16), vh,
                preferred_element_type=jnp.float32).astype(jnp.bfloat16)

    attn_out = jnp.dot(ctx_ref[...], wo[...],
                       preferred_element_type=jnp.float32) + bo[...]
    x = x + attn_out                                 # residual (+ proj bias)

    # --- MLP branch ---
    h2 = _layer_norm(x, ln2g[...], ln2b[...]).astype(jnp.bfloat16)
    m = jnp.dot(h2, w1[...], preferred_element_type=jnp.float32) + b1[...]
    # TODO(synk): PyTorch nn.GELU() default is exact (erf); using the tanh
    # approximation here since erf has no guaranteed Mosaic lowering.
    m = jax.nn.gelu(m, approximate=True)
    m = jnp.dot(m.astype(jnp.bfloat16), w2[...],
                preferred_element_type=jnp.float32) + b2[...]
    o_ref[...] = (x + m).reshape(bt, s_pad, D)


def vit_block(x, p, num_heads, seq_len, batch_tile):
    B_pad, S_pad, D = x.shape
    Hm = p["w1"].shape[1]
    Bt = batch_tile
    kernel = functools.partial(_vit_block_kernel, num_heads=num_heads,
                               seq_len=seq_len, bt=Bt)

    in_specs = [
        pl.BlockSpec((Bt, S_pad, D), lambda b: (b, 0, 0)),  # x (pipelined)
        _const_spec((1, D)), _const_spec((1, D)),           # ln1 gamma/beta
        _const_spec((D, 3 * D)),                            # wqkv (bf16)
        _const_spec((D, D)),                                # wo   (bf16)
        _const_spec((1, D)),                                # bo
        _const_spec((1, D)), _const_spec((1, D)),           # ln2 gamma/beta
        _const_spec((D, Hm)), _const_spec((1, Hm)),         # fc1
        _const_spec((Hm, D)), _const_spec((1, D)),          # fc2
    ]
    # TODO(synk): for ViT-L/H sizes on v7x, additionally K-tile the MLP matmuls
    # (e.g. pltpu.emit_pipeline over chunks of w1/w2) or split the fused block
    # into attention + MLP kernels so the footprint fits 64 MiB VMEM.
    return pl.pallas_call(
        kernel,
        grid=(B_pad // Bt,),
        in_specs=in_specs,
        out_specs=pl.BlockSpec((Bt, S_pad, D), lambda b: (b, 0, 0)),
        out_shape=jax.ShapeDtypeStruct((B_pad, S_pad, D), jnp.float32),
        scratch_shapes=[pltpu.VMEM((Bt * S_pad, D), jnp.bfloat16)],
        compiler_params=pltpu.CompilerParams(
            dimension_semantics=("parallel",),
            vmem_limit_bytes=_vmem_limit_bytes(),
        ),
    )(x, p["ln1_g"], p["ln1_b"], p["wqkv"], p["wo"], p["bo"],
      p["ln2_g"], p["ln2_b"], p["w1"], p["b1"], p["w2"], p["b2"])


# --------------------------------------------------------------------------
# Final LayerNorm + classification head on the cls token, tiled over batch.
# (LayerNorm is per-token, so norm(x)[:, 0] == norm(x[:, 0]).)
# --------------------------------------------------------------------------
def _head_kernel(x_ref, g_ref, b_ref, w_ref, bh_ref, o_ref):
    h = _layer_norm(x_ref[...], g_ref[...], b_ref[...])
    o_ref[...] = (
        jnp.dot(h.astype(jnp.bfloat16), w_ref[...],
                preferred_element_type=jnp.float32)
        + bh_ref[...]
    )


def head(cls_tokens, g, b, w, bh):
    B, D = cls_tokens.shape
    Cp = w.shape[1]                       # class dim pre-padded to multiple of 128
    TB = 256 if B >= 256 else B
    Bp = _round_up(B, TB)
    if Bp != B:
        cls_tokens = jnp.pad(cls_tokens, ((0, Bp - B), (0, 0)))
    out = pl.pallas_call(
        _head_kernel,
        grid=(Bp // TB,),
        in_specs=[
            pl.BlockSpec((TB, D), lambda i: (i, 0)),
            _const_spec((1, D)),
            _const_spec((1, D)),
            _const_spec((D, Cp)),
            _const_spec((1, Cp)),
        ],
        out_specs=pl.BlockSpec((TB, Cp), lambda i: (i, 0)),
        out_shape=jax.ShapeDtypeStruct((Bp, Cp), jnp.float32),
        compiler_params=pltpu.CompilerParams(dimension_semantics=("parallel",)),
    )(cls_tokens, g, b, w, bh)
    return out[:B]


# --------------------------------------------------------------------------
# Parameter init (deterministic, synthetic) + full forward.
# --------------------------------------------------------------------------
def init_vit_params(key, *, num_classes, img_size, patch_size, in_channels,
                    embed_dim, num_blocks, num_heads, mlp_ratio):
    D = embed_dim
    dh = D // num_heads
    Hm = int(D * mlp_ratio)
    num_patches = (img_size // patch_size) ** 2
    keys = jax.random.split(key, 6 + num_blocks)

    def normal(k, shape, std=0.02):
        return std * jax.random.normal(k, shape, jnp.float32)

    conv_w = normal(keys[0], (D, in_channels, patch_size, patch_size))
    C_pad = _round_up(num_classes, 128)            # lane-dense head output
    head_w = normal(keys[4], (num_classes, D)).T   # (D, C)
    head_b = normal(keys[5], (1, num_classes))

    params = {
        "num_classes": num_classes,
        # conv-as-matmul weight, already (C*P*P, D) and bf16
        "pe_w": conv_w.reshape(D, in_channels * patch_size * patch_size)
                      .T.astype(jnp.bfloat16),
        "pe_b": normal(keys[1], (1, D)),
        "cls_token": normal(keys[2], (1, 1, D)),
        "pos_embed": normal(keys[3], (1, 1 + num_patches, D)),
        "norm_g": jnp.ones((1, D), jnp.float32),
        "norm_b": jnp.zeros((1, D), jnp.float32),
        "head_w": jnp.pad(head_w, ((0, 0), (0, C_pad - num_classes)))
                     .astype(jnp.bfloat16),
        "head_b": jnp.pad(head_b, ((0, 0), (0, C_pad - num_classes))),
        "blocks": [],
    }

    scale = dh ** -0.5
    for i in range(num_blocks):
        bk = jax.random.split(keys[6 + i], 7)
        w_qkv = normal(bk[0], (3 * D, D))          # PyTorch (out, in); qkv_bias=False
        w_proj = normal(bk[1], (D, D))
        wqkv = w_qkv.T                             # (D, 3D): [:, :D]=q, [:,D:2D]=k, [:,2D:]=v
        wqkv = wqkv.at[:, :D].multiply(scale)      # fold 1/sqrt(dh) into W_q (free at runtime)
        params["blocks"].append({
            "ln1_g": jnp.ones((1, D), jnp.float32),
            "ln1_b": jnp.zeros((1, D), jnp.float32),
            "wqkv": wqkv.astype(jnp.bfloat16),
            "wo": w_proj.T.astype(jnp.bfloat16),   # (D, D)
            "bo": normal(bk[2], (1, D)),
            "ln2_g": jnp.ones((1, D), jnp.float32),
            "ln2_b": jnp.zeros((1, D), jnp.float32),
            "w1": normal(bk[3], (Hm, D)).T.astype(jnp.bfloat16),   # (D, Hm)
            "b1": normal(bk[4], (1, Hm)),
            "w2": normal(bk[5], (D, Hm)).T.astype(jnp.bfloat16),   # (Hm, D)
            "b2": normal(bk[6], (1, D)),
        })
    return params


def vit_forward(x, params, *, patch_size, num_heads, num_blocks):
    B, C, H, W = x.shape
    P = patch_size
    Hp, Wp = H // P, W // P
    D = params["pe_w"].shape[1]

    # unfold NCHW image into non-overlapping patches, flattened as (c, ph, pw)
    # (cast to bf16 BEFORE the transpose so the pure-bandwidth unfold moves
    # half the bytes through HBM)
    patches = x.astype(jnp.bfloat16).reshape(B, C, Hp, P, Wp, P)
    patches = patches.transpose(0, 2, 4, 1, 3, 5).reshape(B * Hp * Wp, C * P * P)

    tokens = patch_embed(patches, params["pe_w"], params["pe_b"])
    tokens = tokens.reshape(B, Hp * Wp, D)

    cls = jnp.broadcast_to(params["cls_token"], (B, 1, D))
    x_tok = jnp.concatenate([cls, tokens], axis=1) + params["pos_embed"]
    # pos_dropout / attn_drop / proj_drop / mlp_drop all have rate 0.0 -> identity

    S = x_tok.shape[1]                     # 1 + num_patches
    # Lane-dense attention: S_pad is the last dim of the (S,S) score tiles and
    # the sublane dim of the bf16 matmul LHS -> pad to a multiple of 128.
    # Padded keys are masked in-kernel; padded rows are discarded at the end.
    S_pad = _round_up(S, 128)
    if S_pad != S:
        x_tok = jnp.pad(x_tok, ((0, 0), (0, S_pad - S), (0, 0)))

    # Batch tiling: Bt elements per grid step so the fat matmuls see
    # M = Bt*S_pad rows (better MXU occupancy, fewer per-step overheads).
    # TODO(synk): on v7x prefer Bt=2 and keep the grid >= 2 so both TensorCores
    # are fed; add a second parallel axis when B is very small.
    Bt = 4 if B >= 4 else B
    B_pad = _round_up(B, Bt)
    if B_pad != B:
        x_tok = jnp.pad(x_tok, ((0, B_pad - B), (0, 0), (0, 0)))

    for i in range(num_blocks):
        x_tok = vit_block(x_tok, params["blocks"][i], num_heads, seq_len=S,
                          batch_tile=Bt)

    cls_out = x_tok[:B, 0, :]                              # (B, D)
    logits = head(cls_out, params["norm_g"], params["norm_b"],
                  params["head_w"], params["head_b"])
    return logits[:, :params["num_classes"]]


if __name__ == "__main__":
    cfg = dict(num_classes=16, img_size=16, patch_size=4, in_channels=3,
               embed_dim=32, num_blocks=2, num_heads=4, mlp_ratio=4)
    key = jax.random.PRNGKey(0)
    pkey, xkey = jax.random.split(key)
    params = init_vit_params(pkey, **cfg)
    x = jax.random.normal(
        xkey, (2, cfg["in_channels"], cfg["img_size"], cfg["img_size"]), jnp.float32)

    out = vit_forward(x, params, patch_size=cfg["patch_size"],
                      num_heads=cfg["num_heads"], num_blocks=cfg["num_blocks"])
    out = jax.block_until_ready(out)
    assert out.shape == (2, cfg["num_classes"]), out.shape
    assert bool(jnp.all(jnp.isfinite(out)))
    print("KERNEL_OK")
</pallas_src>

<mosaic_0001>
module attributes {stable_mosaic.version = 11 : i64} {
  func.func @_patch_embed_kernel(%arg0: i32, %arg1: memref<32x48xbf16, #tpu.memory_space<vmem>>, %arg2: memref<48x32xbf16, #tpu.memory_space<vmem>>, %arg3: memref<1x32xf32, #tpu.memory_space<vmem>>, %arg4: memref<32x32xf32, #tpu.memory_space<vmem>>) attributes {dimension_semantics = [#tpu.dimension_semantics<parallel>], iteration_bounds = array<i64: 1>, scalar_prefetch = 0 : i64, scratch_operands = 0 : i64, tpu.core_type = #tpu.core_type<tc>, window_params = [{transform_indices = @transform_0, window_bounds = array<i64: 32, 48>}, {pipeline_mode = #tpu.pipeline_mode<synchronous>, transform_indices = @transform_1, window_bounds = array<i64: 48, 32>}, {pipeline_mode = #tpu.pipeline_mode<synchronous>, transform_indices = @transform_2, window_bounds = array<i64: 1, 32>}, {transform_indices = @transform_3, window_bounds = array<i64: 32, 32>}]} {
    %c0 = arith.constant 0 : index
    %c0_0 = arith.constant 0 : index
    %0 = vector.load %arg1[%c0, %c0_0] : memref<32x48xbf16, #tpu.memory_space<vmem>>, vector<32x48xbf16>
    %c0_1 = arith.constant 0 : index
    %c0_2 = arith.constant 0 : index
    %1 = vector.load %arg2[%c0_1, %c0_2] : memref<48x32xbf16, #tpu.memory_space<vmem>>, vector<48x32xbf16>
    %cst = arith.constant dense<0.000000e+00> : vector<32x32xf32>
    %2 = tpu.matmul %0, %1, %cst {dimension_numbers = #tpu.dot_dimension_numbers<[1], [0], [0], [1], [0, 0, 1, 1], [], []>} : vector<32x48xbf16>, vector<48x32xbf16>, vector<32x32xf32> -> vector<32x32xf32>
    %c0_3 = arith.constant 0 : index
    %c0_4 = arith.constant 0 : index
    %3 = vector.load %arg3[%c0_3, %c0_4] : memref<1x32xf32, #tpu.memory_space<vmem>>, vector<1x32xf32>
    %4 = vector.broadcast %3 : vector<1x32xf32> to vector<32x32xf32>
    %5 = arith.addf %2, %4 : vector<32x32xf32>
    %c0_5 = arith.constant 0 : index
    %c0_6 = arith.constant 0 : index
    %6 = vector.load %arg4[%c0_5, %c0_6] : memref<32x32xf32, #tpu.memory_space<vmem>>, vector<32x32xf32>
    tpu.vector_store %arg4[%c0_5, %c0_6], %5 {strides = array<i32>} : memref<32x32xf32, #tpu.memory_space<vmem>>, vector<32x32xf32>,
    return
  }
  func.func @transform_0(%arg0: i32) -> (i32, i32) {
    %c0_i32 = arith.constant 0 : i32
    %c0_i32_0 = arith.constant 0 : i32
    return %arg0, %c0_i32 : i32, i32
  }
  func.func @transform_1(%arg0: i32) -> (i32, i32) {
    %c0_i32 = arith.constant 0 : i32
    %c0_i32_0 = arith.constant 0 : i32
    %c0_i32_1 = arith.constant 0 : i32
    return %c0_i32, %c0_i32_0 : i32, i32
  }
  func.func @transform_2(%arg0: i32) -> (i32, i32) {
    %c0_i32 = arith.constant 0 : i32
    %c0_i32_0 = arith.constant 0 : i32
    %c0_i32_1 = arith.constant 0 : i32
    return %c0_i32, %c0_i32_0 : i32, i32
  }
  func.func @transform_3(%arg0: i32) -> (i32, i32) {
    %c0_i32 = arith.constant 0 : i32
    %c0_i32_0 = arith.constant 0 : i32
    return %arg0, %c0_i32 : i32, i32
  }
}

</mosaic_0001>

<bundles_post_ra>
// kernel: tpu_custom_call.1
= control target key start
LH: loop header
LB: loop body
LE: loop exit
PB: predicated region body
PF: predicated region fallthrough
CT: control target
= control target key end

     0   :  { %vm61_vm0 = vcmask 392192   ;;  %s235_s0 = inlined_call_operand.vmem [shape: bf16[32,48], index: 0, kind: input, shape index: {}]   ;;  %s236_s1 = inlined_call_operand.vmem [shape: bf16[48,32], index: 1, kind: input, shape index: {}]   ;;  %s237_s2 = inlined_call_operand.vmem [shape: f32[1,32], index: 2, kind: input, shape index: {}]   ;;  %s238_s3 = inlined_call_operand.hbm [shape: f32[32,32], index: 3, kind: output, shape index: {}]  }
   0x1   :  { %v164_v0 = vld [vmem:[%s236_s1 + $0x10] sm:$0xff]   ;;  %v165_v1 = vld [vmem:[%s236_s1 + $0x8] sm:$0xff]   ;;  %v167_v2 = vld [vmem:[%s235_s0] sm:$0xff]  }
   0x2   :  { %151 = vmatprep.subr.bf16.mxu0 %v164_v0  ;;  %v166_v3 = vld [vmem:[%s236_s1] sm:$0xff]   ;;  %157 = vmatprep.mubr.msk.bf16.mxu0 %vm61_vm0, %v167_v2 }
   0x3   :  { %152 = vmatpush3.bf16.msra.mxu0 %v164_v0 }
   0x4   :  { %153 = vmatprep.subr.bf16.mxu0 %v165_v1 }
   0x5   :  { %8 = vsyncpa [#allocation3], 0  ;;  %v168_v4 = vld [vmem:[%s235_s0 + $0x8] sm:$0xff]   ;;  %v138_v5 = vld [vmem:[%s237_s2] ss:$0 sm:$0xff]  ;;  %vm117_vm1 = vcmask 261120  }
   0x6   :  { %s191_s1 = smov [#allocation2]  }
   0x7   :  { %154 = vmatpush3.bf16.msra.mxu0 %v165_v1  ;;  %s127_s24 = sshll.u32 %s191_s1, 4  ;;  %s128_s24 = int_to_ptr.vmem [resolvable:$true] %s127_s24 }
   0x8   :  { %155 = vmatprep.subr.bf16.mxu0 %v166_v3  ;;  %s169_s0 = scalar_lea.vmem %s128_s24, 512  ;;  %p174_p1 = scmp.lt.s32.totalorder %s128_s24, %s128_s24 }
   0x9   :  { %p170_p0 = scmp.ne.s32.totalorder %s128_s24, %s169_s0  ;;  %p175_p2 = scmp.lt.s32.totalorder %s169_s0, %s169_s0 }
   0xb   :  { %156 = vmatpush3.bf16.msra.mxu0 %v166_v3  ;;  %p176_p3 = por %p175_p2, %p174_p1 }
   0xd   :  { %p177_p4 = pnand %p176_p3, %p170_p0 }
   0xe   :  { %158 = vmatmul.mubr.msk.bf16.vlgmr.msra.gmra.mxu0 %vm61_vm0, %v168_v4 }
  0xce   :  { %v159_v6 = vpop.f32.mrf.mxu0 }
  0xcf   :  { %v111_v7 = vadd.f32 %v159_v6, %v138_v5 }
  0xd0   :  { %v102_v8 = vpop.f32.mrf.mxu0 }
  0xd1   :  { %120 = vst.msk [vmem:[#allocation2 + $0x10] sm:$0xff] %vm117_vm1, %v111_v7  ;;  %v103_v9 = vadd.f32 %v138_v5, %v102_v8 }
  0xd2   :  { %v160_v10 = vpop.f32.mrf.mxu0 }
  0xd3   :  { %118 = vst.msk [vmem:[#allocation2] sm:$0xff] %vm117_vm1, %v103_v9  ;;  %v114_v11 = vadd.f32 %v160_v10, %v138_v5 }
  0xd4   :  { %v105_v12 = vpop.f32.mrf.mxu0 }
  0xd5   :  { %121 = vst.msk [vmem:[#allocation2 + $0x18] sm:$0xff] %vm117_vm1, %v114_v11  ;;  %v106_v13 = vadd.f32 %v138_v5, %v105_v12 }
  0xd7   :  { %119 = vst.msk [vmem:[#allocation2 + $0x8] sm:$0xff] %vm117_vm1, %v106_v13 }
  0xd8   :  { %180 = shalt.err (!%p177_p4)
}
  0xd9   :  { %s192_s2 = smov 128   ;;  %s193_s25 = smov 8  }
  0xda   :  { %133 = dma.vmem_to_hbm [thread:$0]  %s128_s24, 512, %s238_s3, [#allocation3], %s192_s2, %s192_s2, %s193_s25  }
  0xdb   :  { %189 = dma.done.wait [#allocation3], 512  }
  0xdc   :  { %190 = vsyncadd [#allocation3], 4294966784 }
  0xdd   :  { %137 = vsyncpa [#allocation3], 1 }

</bundles_post_ra>
